<compile_context>
chip_gen: v7x
topology: tpu7x:2x2x1
jax: 0.10.0
libtpu: 0.0.40
codegen_flags: <defaults>
</compile_context>

<pallas_src>
import functools

import jax
import jax.numpy as jnp
from jax.experimental import pallas as pl
from jax.experimental.pallas import tpu as pltpu


def _round_up(x: int, m: int) -> int:
    return (x + m - 1) // m * m


@functools.lru_cache(maxsize=1)
def _vmem_limit_bytes() -> int:
    """Per-generation VMEM budget (static, queried once)."""
    try:
        cap = int(pltpu.get_tpu_info().vmem_capacity_bytes)
    except Exception:
        cap = 64 << 20  # conservative fallback, safe on every generation
    if cap <= (64 << 20):
        return 48 << 20   # v7x: 64 MiB physical, leave headroom for buffers/scratch
    return 100 << 20      # v5e / v6e: 128 MiB physical


def mlp_kernel(x_ref, w_ref, b_ref, s_ref, c_ref, o_ref):
    """Fused 3-layer MLP with BatchNorm pre-folded into the Linears.

    x_ref: (TILE_N, Fp)   activation tile (pipelined over the N grid)
    w_ref: (3, Fp, Fp)    folded Linear weights, bf16, layout [in, out]
                          (single VMEM-resident copy, grid-invariant)
    b_ref: (3, Fp)        folded Linear biases, f32
    s_ref: (1, Fp)        final BN scale  (gamma3 * rsqrt(var3 + eps)), f32
    c_ref: (1, Fp)        final BN shift  (beta3 - mean3 * scale), f32
    o_ref: (TILE_N, Fp)   output tile
    """
    h = x_ref[...]
    # Hoist the per-layer bias rows once (static unroll over the 3 layers).
    b0 = b_ref[0:1, :]
    b1 = b_ref[1:2, :]
    b2 = b_ref[2:3, :]
    # Dropout(p=0.025) is identity in eval mode.
    # bf16 operands feed the MXU at full rate; accumulate + epilogue in f32.
    h = jnp.maximum(
        jnp.dot(h.astype(jnp.bfloat16), w_ref[0], preferred_element_type=jnp.float32)
        + b0, 0.0)
    h = jnp.maximum(
        jnp.dot(h.astype(jnp.bfloat16), w_ref[1], preferred_element_type=jnp.float32)
        + b1, 0.0)
    h = jnp.maximum(
        jnp.dot(h.astype(jnp.bfloat16), w_ref[2], preferred_element_type=jnp.float32)
        + b2, 0.0)
    # Last BatchNorm as a single per-feature FMA (f32 VPU; hides under MXU/DMA).
    o_ref[...] = (h * s_ref[...] + c_ref[...]).astype(o_ref.dtype)


def mlp_prepare(w, b, gamma, beta, mean, var, eps: float = 1e-5):
    """One-time fold of BatchNorm into the Linears + padding/casting.

    w: (3, F, F) [in, out]; b/gamma/beta/mean/var: (3, F).
    Returns (w_p_bf16, b_p_f32, s_p_f32, c_p_f32, F) ready for mlp_forward.
    """
    F = w.shape[-1]
    assert w.shape == (3, F, F), "module requires in_feats == out_feats"

    s = gamma * jax.lax.rsqrt(var + eps)          # (3, F)
    c = beta - mean * s                           # (3, F)
    # Fold BN_l into Linear_{l+1}:  W' = s[:,None]*W,  b' = c @ W + b   (f32).
    w_f = jnp.stack([w[0], s[0][:, None] * w[1], s[1][:, None] * w[2]])   # (3, F, F)
    b_f = jnp.stack([b[0], c[0] @ w[1] + b[1], c[1] @ w[2] + b[2]])       # (3, F)

    LANE = 128
    Fp = _round_up(F, LANE)
    w_p = (jnp.zeros((3, Fp, Fp), jnp.bfloat16)
           .at[:, :F, :F].set(w_f.astype(jnp.bfloat16)))
    b_p = jnp.zeros((3, Fp), jnp.float32).at[:, :F].set(b_f.astype(jnp.float32))
    s_p = jnp.zeros((1, Fp), jnp.float32).at[:, :F].set(s[2][None, :].astype(jnp.float32))
    c_p = jnp.zeros((1, Fp), jnp.float32).at[:, :F].set(c[2][None, :].astype(jnp.float32))
    return w_p, b_p, s_p, c_p, F


@functools.partial(jax.jit, static_argnames=("feats", "tile_n", "vmem_limit"))
def _mlp_forward(x, w_p, b_p, s_p, c_p, *, feats, tile_n, vmem_limit):
    N, F = x.shape
    assert F == feats
    Fp = w_p.shape[-1]

    # Sublane alignment (bf16 activations need 16-row tiles).
    sub = 16 if x.dtype == jnp.bfloat16 else 8

    # Batch tiling: biggest tile that VMEM allows, but split into >= 2 grid
    # steps when N is large enough so v7x's two TensorCores both get work.
    tile_n = max(sub, min(tile_n, _round_up(N, sub)))
    if tile_n >= N and N >= 2 * sub:
        tile_n = _round_up(pl.cdiv(N, 2), sub)
    tile_n = _round_up(tile_n, sub)
    Np = _round_up(N, tile_n)

    # Pad activations only when actually needed (avoids an extra HBM pass).
    needs_pad = (Np, Fp) != (N, F)
    x_p = x if not needs_pad else jnp.zeros((Np, Fp), x.dtype).at[:N, :F].set(x)

    grid = (Np // tile_n,)
    vmem_spec = pl.BlockSpec(memory_space=pltpu.MemorySpace.VMEM)

    out_p = pl.pallas_call(
        mlp_kernel,
        out_shape=jax.ShapeDtypeStruct((Np, Fp), x.dtype),
        grid_spec=pltpu.PrefetchScalarGridSpec(
            num_scalar_prefetch=0,
            grid=grid,
            in_specs=[
                # Activations: double-buffer pipelined over the N grid axis.
                pl.BlockSpec((tile_n, Fp), lambda i: (i, 0)),
                # Folded weights / biases / final BN scale+shift: un-blocked
                # VMEM refs -> exactly one resident copy for the whole grid.
                vmem_spec,   # w_p  (3, Fp, Fp) bf16
                vmem_spec,   # b_p  (3, Fp)     f32
                vmem_spec,   # s_p  (1, Fp)     f32
                vmem_spec,   # c_p  (1, Fp)     f32
            ],
            out_specs=pl.BlockSpec((tile_n, Fp), lambda i: (i, 0)),
        ),
        compiler_params=pltpu.CompilerParams(
            dimension_semantics=("parallel",),
            vmem_limit_bytes=vmem_limit,
        ),
    )(x_p, w_p, b_p, s_p, c_p)

    return out_p if not needs_pad else out_p[:N, :F]


def mlp_forward(x, prepared, *, tile_n: int = 512):
    """x: (N, F); prepared = mlp_prepare(...) outputs (call prepare once)."""
    w_p, b_p, s_p, c_p, F = prepared
    return _mlp_forward(x, w_p, b_p, s_p, c_p, feats=F, tile_n=tile_n,
                        vmem_limit=_vmem_limit_bytes())


def mlp_reference(x, w, b, gamma, beta, mean, var):
    """Pure-JAX unfused reference (Linear -> ReLU -> BatchNorm, eval mode)."""
    eps = 1e-5
    h = x.astype(jnp.float32)
    for l in range(3):
        y = h @ w[l] + b[l][None, :]
        y = jnp.maximum(y, 0.0)
        h = (y - mean[l][None, :]) * jax.lax.rsqrt(var[l][None, :] + eps) * gamma[l][
            None, :
        ] + beta[l][None, :]
    return h.astype(x.dtype)


if __name__ == "__main__":
    N = 8          # batch
    F = 32         # in_feats == out_feats (required for the module to be well-typed)

    key = jax.random.PRNGKey(0)
    kx, kw, kb, kg, kbe, km, kv = jax.random.split(key, 7)

    x = jax.random.normal(kx, (N, F), dtype=jnp.float32)
    # Linear weights: PyTorch stores [out, in]; we use [in, out] layout here.
    w = 0.1 * jax.random.normal(kw, (3, F, F), dtype=jnp.float32)
    b = 0.05 * jax.random.normal(kb, (3, F), dtype=jnp.float32)
    # BatchNorm parameters / running stats (deterministic, non-trivial).
    gamma = 1.0 + 0.1 * jax.random.normal(kg, (3, F), dtype=jnp.float32)
    beta = 0.1 * jax.random.normal(kbe, (3, F), dtype=jnp.float32)
    mean = 0.1 * jax.random.normal(km, (3, F), dtype=jnp.float32)
    var = 0.5 + jnp.abs(jax.random.normal(kv, (3, F), dtype=jnp.float32))

    # One-time prepare (BN fold + padding + bf16 cast), then the hot-path call.
    prepared = mlp_prepare(w, b, gamma, beta, mean, var)
    out = mlp_forward(x, prepared)
    out = jax.block_until_ready(out)

    ref = mlp_reference(x, w, b, gamma, beta, mean, var)
    assert out.shape == (N, F)
    # bf16 MXU operands (f32 accumulate/epilogue) -> slightly looser tolerance.
    assert jnp.allclose(out, ref, atol=2e-2, rtol=2e-2), "Pallas output mismatch"

    print("KERNEL_OK")
</pallas_src>

<mosaic_0001>
module attributes {stable_mosaic.version = 11 : i64} {
  func.func @mlp_kernel(%arg0: i32, %arg1: memref<8x128xf32, #tpu.memory_space<vmem>>, %arg2: memref<3x128x128xbf16, #tpu.memory_space<vmem>>, %arg3: memref<3x128xf32, #tpu.memory_space<vmem>>, %arg4: memref<1x128xf32, #tpu.memory_space<vmem>>, %arg5: memref<1x128xf32, #tpu.memory_space<vmem>>, %arg6: memref<8x128xf32, #tpu.memory_space<vmem>>) attributes {dimension_semantics = [#tpu.dimension_semantics<parallel>], iteration_bounds = array<i64: 1>, scalar_prefetch = 0 : i64, scratch_operands = 0 : i64, tpu.core_type = #tpu.core_type<tc>, window_params = [{transform_indices = @transform_0, window_bounds = array<i64: 8, 128>}, {pipeline_mode = #tpu.pipeline_mode<synchronous>, transform_indices = @transform_1, window_bounds = array<i64: 3, 128, 128>}, {pipeline_mode = #tpu.pipeline_mode<synchronous>, transform_indices = @transform_2, window_bounds = array<i64: 3, 128>}, {pipeline_mode = #tpu.pipeline_mode<synchronous>, transform_indices = @transform_3, window_bounds = array<i64: 1, 128>}, {pipeline_mode = #tpu.pipeline_mode<synchronous>, transform_indices = @transform_4, window_bounds = array<i64: 1, 128>}, {transform_indices = @transform_5, window_bounds = array<i64: 8, 128>}]} {
    %c0 = arith.constant 0 : index
    %c0_0 = arith.constant 0 : index
    %0 = vector.load %arg1[%c0, %c0_0] : memref<8x128xf32, #tpu.memory_space<vmem>>, vector<8x128xf32>
    %c0_1 = arith.constant 0 : index
    %c0_2 = arith.constant 0 : index
    %1 = vector.load %arg3[%c0_1, %c0_2] : memref<3x128xf32, #tpu.memory_space<vmem>>, vector<1x128xf32>
    %c1 = arith.constant 1 : index
    %c0_3 = arith.constant 0 : index
    %2 = vector.load %arg3[%c1, %c0_3] : memref<3x128xf32, #tpu.memory_space<vmem>>, vector<1x128xf32>
    %c2 = arith.constant 2 : index
    %c0_4 = arith.constant 0 : index
    %3 = vector.load %arg3[%c2, %c0_4] : memref<3x128xf32, #tpu.memory_space<vmem>>, vector<1x128xf32>
    %4 = arith.truncf %0 : vector<8x128xf32> to vector<8x128xbf16>
    %c0_5 = arith.constant 0 : index
    %c0_6 = arith.constant 0 : index
    %c0_7 = arith.constant 0 : index
    %5 = vector.load %arg2[%c0_5, %c0_6, %c0_7] : memref<3x128x128xbf16, #tpu.memory_space<vmem>>, vector<1x128x128xbf16>
    %6 = vector.shape_cast %5 : vector<1x128x128xbf16> to vector<128x128xbf16>
    %cst = arith.constant dense<0.000000e+00> : vector<8x128xf32>
    %7 = tpu.matmul %4, %6, %cst {dimension_numbers = #tpu.dot_dimension_numbers<[1], [0], [0], [1], [0, 0, 1, 1], [], []>} : vector<8x128xbf16>, vector<128x128xbf16>, vector<8x128xf32> -> vector<8x128xf32>
    %8 = vector.broadcast %1 : vector<1x128xf32> to vector<8x128xf32>
    %9 = arith.addf %7, %8 : vector<8x128xf32>
    %cst_8 = arith.constant 0.000000e+00 : f32
    %10 = vector.broadcast %cst_8 : f32 to vector<8x128xf32>
    %11 = arith.maximumf %9, %10 : vector<8x128xf32>
    %12 = arith.truncf %11 : vector<8x128xf32> to vector<8x128xbf16>
    %c1_9 = arith.constant 1 : index
    %c0_10 = arith.constant 0 : index
    %c0_11 = arith.constant 0 : index
    %13 = vector.load %arg2[%c1_9, %c0_10, %c0_11] : memref<3x128x128xbf16, #tpu.memory_space<vmem>>, vector<1x128x128xbf16>
    %14 = vector.shape_cast %13 : vector<1x128x128xbf16> to vector<128x128xbf16>
    %cst_12 = arith.constant dense<0.000000e+00> : vector<8x128xf32>
    %15 = tpu.matmul %12, %14, %cst_12 {dimension_numbers = #tpu.dot_dimension_numbers<[1], [0], [0], [1], [0, 0, 1, 1], [], []>} : vector<8x128xbf16>, vector<128x128xbf16>, vector<8x128xf32> -> vector<8x128xf32>
    %16 = vector.broadcast %2 : vector<1x128xf32> to vector<8x128xf32>
    %17 = arith.addf %15, %16 : vector<8x128xf32>
    %cst_13 = arith.constant 0.000000e+00 : f32
    %18 = vector.broadcast %cst_13 : f32 to vector<8x128xf32>
    %19 = arith.maximumf %17, %18 : vector<8x128xf32>
    %20 = arith.truncf %19 : vector<8x128xf32> to vector<8x128xbf16>
    %c2_14 = arith.constant 2 : index
    %c0_15 = arith.constant 0 : index
    %c0_16 = arith.constant 0 : index
    %21 = vector.load %arg2[%c2_14, %c0_15, %c0_16] : memref<3x128x128xbf16, #tpu.memory_space<vmem>>, vector<1x128x128xbf16>
    %22 = vector.shape_cast %21 : vector<1x128x128xbf16> to vector<128x128xbf16>
    %cst_17 = arith.constant dense<0.000000e+00> : vector<8x128xf32>
    %23 = tpu.matmul %20, %22, %cst_17 {dimension_numbers = #tpu.dot_dimension_numbers<[1], [0], [0], [1], [0, 0, 1, 1], [], []>} : vector<8x128xbf16>, vector<128x128xbf16>, vector<8x128xf32> -> vector<8x128xf32>
    %24 = vector.broadcast %3 : vector<1x128xf32> to vector<8x128xf32>
    %25 = arith.addf %23, %24 : vector<8x128xf32>
    %cst_18 = arith.constant 0.000000e+00 : f32
    %26 = vector.broadcast %cst_18 : f32 to vector<8x128xf32>
    %27 = arith.maximumf %25, %26 : vector<8x128xf32>
    %c0_19 = arith.constant 0 : index
    %c0_20 = arith.constant 0 : index
    %28 = vector.load %arg4[%c0_19, %c0_20] : memref<1x128xf32, #tpu.memory_space<vmem>>, vector<1x128xf32>
    %29 = vector.broadcast %28 : vector<1x128xf32> to vector<8x128xf32>
    %30 = arith.mulf %27, %29 : vector<8x128xf32>
    %c0_21 = arith.constant 0 : index
    %c0_22 = arith.constant 0 : index
    %31 = vector.load %arg5[%c0_21, %c0_22] : memref<1x128xf32, #tpu.memory_space<vmem>>, vector<1x128xf32>
    %32 = vector.broadcast %31 : vector<1x128xf32> to vector<8x128xf32>
    %33 = arith.addf %30, %32 : vector<8x128xf32>
    %c0_23 = arith.constant 0 : index
    %c0_24 = arith.constant 0 : index
    %34 = vector.load %arg6[%c0_23, %c0_24] : memref<8x128xf32, #tpu.memory_space<vmem>>, vector<8x128xf32>
    tpu.vector_store %arg6[%c0_23, %c0_24], %33 {strides = array<i32>} : memref<8x128xf32, #tpu.memory_space<vmem>>, vector<8x128xf32>,
    return
  }
  func.func @transform_0(%arg0: i32) -> (i32, i32) {
    %c0_i32 = arith.constant 0 : i32
    %c0_i32_0 = arith.constant 0 : i32
    return %arg0, %c0_i32 : i32, i32
  }
  func.func @transform_1(%arg0: i32) -> (i32, i32, i32) {
    %c0_i32 = arith.constant 0 : i32
    %c0_i32_0 = arith.constant 0 : i32
    %c0_i32_1 = arith.constant 0 : i32
    %c0_i32_2 = arith.constant 0 : i32
    return %c0_i32, %c0_i32_0, %c0_i32_1 : i32, i32, i32
  }
  func.func @transform_2(%arg0: i32) -> (i32, i32) {
    %c0_i32 = arith.constant 0 : i32
    %c0_i32_0 = arith.constant 0 : i32
    %c0_i32_1 = arith.constant 0 : i32
    return %c0_i32, %c0_i32_0 : i32, i32
  }
  func.func @transform_3(%arg0: i32) -> (i32, i32) {
    %c0_i32 = arith.constant 0 : i32
    %c0_i32_0 = arith.constant 0 : i32
    %c0_i32_1 = arith.constant 0 : i32
    return %c0_i32, %c0_i32_0 : i32, i32
  }
  func.func @transform_4(%arg0: i32) -> (i32, i32) {
    %c0_i32 = arith.constant 0 : i32
    %c0_i32_0 = arith.constant 0 : i32
    %c0_i32_1 = arith.constant 0 : i32
    return %c0_i32, %c0_i32_0 : i32, i32
  }
  func.func @transform_5(%arg0: i32) -> (i32, i32) {
    %c0_i32 = arith.constant 0 : i32
    %c0_i32_0 = arith.constant 0 : i32
    return %arg0, %c0_i32 : i32, i32
  }
}

</mosaic_0001>

<bundles_post_ra>
// kernel: _mlp_forward.1
= control target key start
LH: loop header
LB: loop body
LE: loop exit
PB: predicated region body
PF: predicated region fallthrough
CT: control target
= control target key end

     0   :  { %10 = vsyncpa [#allocation3], 0  ;;  %s706_s0 = inlined_call_operand.vmem [shape: f32[8,128], index: 0, kind: input, shape index: {}]   ;;  %s707_s1 = inlined_call_operand.hbm [shape: bf16[3,128,128], index: 1, kind: input, shape index: {}]   ;;  %s708_s2 = inlined_call_operand.vmem [shape: f32[3,128], index: 2, kind: input, shape index: {}]   ;;  %s709_s3 = inlined_call_operand.vmem [shape: f32[1,128], index: 3, kind: input, shape index: {}]   ;;  %s710_s4 = inlined_call_operand.vmem [shape: f32[1,128], index: 4, kind: input, shape index: {}]   ;;  %s711_s5 = inlined_call_operand.hbm [shape: f32[8,128], index: 5, kind: output, shape index: {}]  }
   0x1   :  { %11 = vsyncpa [#allocation4], 0  ;;  %s598_s18 = smov [#allocation2]   ;;  %s550_s22 = scalar_lea.hbm %s707_s1, 3072 }
   0x2   :  { %s19_s19 = sshll.u32 %s598_s18, 4  ;;  %p551_p0 = scmp.ne.s32.totalorder %s707_s1, %s550_s22  ;;  %s20_s19 = int_to_ptr.vmem [resolvable:$true] %s19_s19 }
   0x3   :  { %p554_p1 = scmp.lt.u32.totalorder %s550_s22, %s707_s1 }
   0x5   :  { %p556_p2 = pnand %p554_p1, %p551_p0 }
   0x7   :  { %559 = shalt.err (!%p556_p2)
}
   0x8   :  { %s560_s27 = scalar_lea.vmem %s20_s19, 3072  ;;  %p565_p4 = scmp.lt.s32.totalorder %s20_s19, %s20_s19 }
   0x9   :  { %p561_p3 = scmp.ne.s32.totalorder %s20_s19, %s560_s27  ;;  %p566_p5 = scmp.lt.s32.totalorder %s560_s27, %s560_s27 }
   0xb   :  { %p567_p6 = por %p566_p5, %p565_p4 }
   0xd   :  { %p568_p7 = pnand %p567_p6, %p561_p3 }
   0xf   :  { %571 = shalt.err (!%p568_p7)
}
  0x10   :  { %s599_s28 = smov 64   ;;  %s600_s29 = smov 4  }
  0x11   :  { %25 = dma.hbm_to_vmem [thread:$0]  %s707_s1, 3072, %s20_s19, [#allocation3], %s599_s28, %s599_s28, %s600_s29  }
  0x12   :  { %594 = dma.done.wait [#allocation3], 3072  }
  0x13   :  { %595 = vsyncadd [#allocation3], 4294964224  ;;  %v601_v0 = vmov 0.0   ;;  %vm602_vm0 = vmmov 0   ;;  %v526_v1 = vld [vmem:[#allocation2] sm:$0xff]   ;;  %v527_v2 = vld [vmem:[#allocation2 + $0x8] sm:$0xff]  }
  0x14   :  { %460 = vmatprep.subr.bf16.mxu0 %v601_v0  ;;  %476 = vmatprep.mubr.msk.bf16.mxu0 %vm602_vm0, %v601_v0  ;;  %v528_v3 = vld [vmem:[#allocation2 + $0x10] sm:$0xff]   ;;  %v534_v4 = vld [vmem:[#allocation2 + $0x40] sm:$0xff]   ;;  %v529_v5 = vld [vmem:[#allocation2 + $0x18] sm:$0xff]   ;;  %s603_s17 = smov [#allocation5]  }
  0x15   :  { %480 = vmatprep.subr.bf16.mxu1 %v601_v0  ;;  %496 = vmatprep.mubr.msk.bf16.mxu1 %vm602_vm0, %v601_v0  ;;  %v535_v6 = vld [vmem:[#allocation2 + $0x48] sm:$0xff]   ;;  %v530_v7 = vld [vmem:[#allocation2 + $0x20] sm:$0xff]   ;;  %v536_v8 = vld [vmem:[#allocation2 + $0x50] sm:$0xff]   ;;  %s395_s18 = sshll.u32 %s603_s17, 4  ;;  %s396_s18 = int_to_ptr.vmem [resolvable:$true] %s395_s18 }
  0x16   :  { %461 = vmatpush3.bf16.msra.mxu0 %v526_v1  ;;  %481 = vmatpush3.bf16.msra.mxu1 %v534_v4  ;;  %v531_v9 = vld [vmem:[#allocation2 + $0x28] sm:$0xff]   ;;  %v537_v10 = vld [vmem:[#allocation2 + $0x58] sm:$0xff]   ;;  %v532_v11 = vld [vmem:[#allocation2 + $0x30] sm:$0xff]   ;;  %p577_p9 = scmp.lt.s32.totalorder %s396_s18, %s396_s18 }
  0x17   :  { %462 = vmatprep.subr.bf16.mxu0 %v601_v0  ;;  %482 = vmatprep.subr.bf16.mxu1 %v601_v0  ;;  %v538_v12 = vld [vmem:[#allocation2 + $0x60] sm:$0xff]   ;;  %v533_v13 = vld [vmem:[#allocation2 + $0x38] sm:$0xff]   ;;  %v539_v15 = vld [vmem:[#allocation2 + $0x68] sm:$0xff]  }
  0x18   :  { %v36_v14 = vld [vmem:[%s706_s0] sm:$0xff]  ;;  %v540_v17 = vld [vmem:[#allocation2 + $0x70] sm:$0xff]   ;;  %v541_v18 = vld [vmem:[#allocation2 + $0x78] sm:$0xff]  }
  0x19   :  { %v40_v16 = vpack.c.bf16 %v36_v14, %v36_v14  ;;  %v542_v19 = vld [vmem:[#allocation2 + $0x80] sm:$0xff]   ;;  %v543_v20 = vld [vmem:[#allocation2 + $0x88] sm:$0xff]   ;;  %v544_v21 = vld [vmem:[#allocation2 + $0x90] sm:$0xff]  }
  0x1a   :  { %463 = vmatpush3.bf16.msra.mxu0 %v527_v2  ;;  %483 = vmatpush3.bf16.msra.mxu1 %v535_v6  ;;  %v545_v22 = vld [vmem:[#allocation2 + $0x98] sm:$0xff]   ;;  %v546_v23 = vld [vmem:[#allocation2 + $0xa0] sm:$0xff]   ;;  %v547_v24 = vld [vmem:[#allocation2 + $0xa8] sm:$0xff]  }
  0x1b   :  { %464 = vmatprep.subr.bf16.mxu0 %v601_v0  ;;  %484 = vmatprep.subr.bf16.mxu1 %v601_v0  ;;  %v404_v25 = vld [vmem:[%s708_s2] ss:$0 sm:$0xff]  ;;  %v548_v33 = vld [vmem:[#allocation2 + $0xb0] sm:$0xff]   ;;  %v549_v34 = vld [vmem:[#allocation2 + $0xb8] sm:$0xff]  }
  0x1c   :  { %v413_v35 = vld [vmem:[%s708_s2 + $0x1] ss:$0 sm:$0xff]  ;;  %v422_v43 = vld [vmem:[%s708_s2 + $0x2] ss:$0 sm:$0xff]  ;;  %v431_v47 = vld [vmem:[%s709_s3] ss:$0 sm:$0xff] }
  0x1d   :  { %v432_v51 = vld [vmem:[%s710_s4] ss:$0 sm:$0xff]  ;;  %s572_s2 = scalar_lea.vmem %s396_s18, 128 }
  0x1e   :  { %465 = vmatpush3.bf16.msra.mxu0 %v528_v3  ;;  %485 = vmatpush3.bf16.msra.mxu1 %v536_v8  ;;  %p573_p8 = scmp.ne.s32.totalorder %s396_s18, %s572_s2  ;;  %p578_p10 = scmp.lt.s32.totalorder %s572_s2, %s572_s2 }
  0x1f   :  { %466 = vmatprep.subr.bf16.mxu0 %v601_v0  ;;  %486 = vmatprep.subr.bf16.mxu1 %v601_v0 }
  0x20   :  { %p579_p11 = por %p578_p10, %p577_p9 }
  0x22   :  { %467 = vmatpush3.bf16.msra.mxu0 %v529_v5  ;;  %487 = vmatpush3.bf16.msra.mxu1 %v537_v10  ;;  %p580_p12 = pnand %p579_p11, %p573_p8 }
  0x23   :  { %468 = vmatprep.subr.bf16.mxu0 %v601_v0  ;;  %488 = vmatprep.subr.bf16.mxu1 %v601_v0 }
  0x26   :  { %469 = vmatpush3.bf16.msra.mxu0 %v530_v7  ;;  %489 = vmatpush3.bf16.msra.mxu1 %v538_v12 }
  0x27   :  { %470 = vmatprep.subr.bf16.mxu0 %v601_v0  ;;  %490 = vmatprep.subr.bf16.mxu1 %v601_v0 }
  0x2a   :  { %471 = vmatpush3.bf16.msra.mxu0 %v531_v9  ;;  %491 = vmatpush3.bf16.msra.mxu1 %v539_v15 }
  0x2b   :  { %472 = vmatprep.subr.bf16.mxu0 %v601_v0  ;;  %492 = vmatprep.subr.bf16.mxu1 %v601_v0 }
  0x2e   :  { %473 = vmatpush3.bf16.msra.mxu0 %v532_v11  ;;  %493 = vmatpush3.bf16.msra.mxu1 %v540_v17 }
  0x2f   :  { %474 = vmatprep.subr.bf16.mxu0 %v601_v0  ;;  %494 = vmatprep.subr.bf16.mxu1 %v601_v0 }
  0x32   :  { %475 = vmatpush3.bf16.msra.mxu0 %v533_v13  ;;  %495 = vmatpush3.bf16.msra.mxu1 %v541_v18 }
  0x33   :  { %500 = vmatprep.subr.bf16.mxu0 %v601_v0 }
  0x35   :  { %477 = vmatmul.mubr.bf16.vlgmr.msra.gmra.mrb[0].mxu0 %v40_v16 }
  0x36   :  { %516 = vmatprep.mubr.msk.bf16.mxu0 %vm602_vm0, %v601_v0  ;;  %501 = vmatpush3.bf16.msra.mxu0 %v542_v19 }
  0x37   :  { %502 = vmatprep.subr.bf16.mxu0 %v601_v0 }
  0x3a   :  { %503 = vmatpush3.bf16.msra.mxu0 %v543_v20 }
  0x3b   :  { %504 = vmatprep.subr.bf16.mxu0 %v601_v0 }
  0x3e   :  { %505 = vmatpush3.bf16.msra.mxu0 %v544_v21 }
  0x3f   :  { %506 = vmatprep.subr.bf16.mxu0 %v601_v0 }
  0x42   :  { %507 = vmatpush3.bf16.msra.mxu0 %v545_v22 }
  0x43   :  { %508 = vmatprep.subr.bf16.mxu0 %v601_v0 }
  0x46   :  { %509 = vmatpush3.bf16.msra.mxu0 %v546_v23 }
  0x47   :  { %510 = vmatprep.subr.bf16.mxu0 %v601_v0 }
  0x4a   :  { %511 = vmatpush3.bf16.msra.mxu0 %v547_v24 }
  0x4b   :  { %512 = vmatprep.subr.bf16.mxu0 %v601_v0 }
  0x4e   :  { %513 = vmatpush3.bf16.msra.mxu0 %v548_v33 }
  0x4f   :  { %514 = vmatprep.subr.bf16.mxu0 %v601_v0 }
  0x52   :  { %515 = vmatpush3.bf16.msra.mxu0 %v549_v34 }
 0x108   :  { %v143_v26 = vpop.f32.mrb[0].mxu0 }
 0x109   :  { %v144_v27 = vadd.f32 %v404_v25, %v143_v26  ;;  %v478_v28 = vpop.f32.mrb[1].mxu0 }
 0x10a   :  { %v146_v29 = vpop.f32.mrb[2].mxu0 }
 0x10b   :  { %v149_v30 = vmax.f32 %v144_v27, 0.0  ;;  %v479_v31 = vpop.f32.mrb[3].mxu0 }
 0x10d   :  { %v150_v32 = vpack.c.bf16 %v149_v30, %v149_v30 }
 0x10f   :  { %497 = vmatmul.mubr.bf16.vlgmr.msra.gmra.mrb[0].mxu1 %v150_v32 }
 0x1e2   :  { %v254_v36 = vpop.f32.mrb[0].mxu1 }
 0x1e3   :  { %v255_v37 = vadd.f32 %v413_v35, %v254_v36  ;;  %v498_v38 = vpop.f32.mrb[1].mxu1 }
 0x1e4   :  { %v257_v39 = vpop.f32.mrb[2].mxu1 }
 0x1e5   :  { %v260_v40 = vmax.f32 %v255_v37, 0.0  ;;  %v499_v41 = vpop.f32.mrb[3].mxu1 }
 0x1e7   :  { %v261_v42 = vpack.c.bf16 %v260_v40, %v260_v40 }
 0x1e9   :  { %517 = vmatmul.mubr.bf16.vlgmr.msra.gmra.mrb[4].mxu0 %v261_v42 }
 0x2bc   :  { %v365_v44 = vpop.f32.mrb[4].mxu0 }
 0x2bd   :  { %v366_v45 = vadd.f32 %v422_v43, %v365_v44  ;;  %v518_v46 = vpop.f32.mrb[5].mxu0 }
 0x2be   :  { %v368_v48 = vpop.f32.mrb[6].mxu0 }
 0x2bf   :  { %v371_v49 = vmax.f32 %v366_v45, 0.0  ;;  %v519_v50 = vpop.f32.mrb[7].mxu0 }
 0x2c1   :  { %v379_v52 = vmul.f32 %v431_v47, %v371_v49 }
 0x2c3   :  { %v387_v53 = vadd.f32 %v432_v51, %v379_v52 }
 0x2c5   :  { %388 = vst [vmem:[#allocation5] sm:$0xff] %v387_v53 }
 0x2c6   :  { %583 = shalt.err (!%p580_p12)
}
 0x2c7   :  { %s584_s20 = scalar_lea.hbm %s711_s5, 128 }
 0x2c8   :  { %p585_p13 = scmp.ne.s32.totalorder %s711_s5, %s584_s20  ;;  %p588_p0 = scmp.lt.u32.totalorder %s584_s20, %s711_s5 }
 0x2ca   :  { %p590_p1 = pnand %p588_p0, %p585_p13 }
 0x2cc   :  { %593 = shalt.err (!%p590_p1)
}
 0x2cd   :  { %398 = dma.vmem_to_hbm [thread:$0]  %s396_s18, 128, %s711_s5, [#allocation4]  }
 0x2ce   :  { %596 = dma.done.wait [#allocation4], 128  }
 0x2cf   :  { %597 = vsyncadd [#allocation4], 4294967168 }
 0x2d0   :  { %402 = vsyncpa [#allocation3], 1 }
 0x2d1   :  { %403 = vsyncpa [#allocation4], 1 }

</bundles_post_ra>
